<compile_context>
chip_gen: v7x
topology: tpu7x:2x2x1
jax: 0.10.0
libtpu: 0.0.40
codegen_flags: <defaults>
</compile_context>

<pallas_src>
import functools

import jax
import jax.numpy as jnp
from jax import lax
from jax.experimental import pallas as pl
from jax.experimental.pallas import tpu as pltpu


def spatial_attention_kernel(x_ref, w_ref, out_ref, *, kernel_size, block_rows):
    """x_ref: (Nb, C, L) VMEM block; w_ref: (2, K) SMEM taps; out_ref: (Nb, L)."""
    f32 = jnp.float32
    K = kernel_size
    pad = K // 2
    nb = block_rows

    x = x_ref[...].astype(f32)                      # (Nb, C, L); f32 accumulation
    L = x.shape[-1]

    # Channel pooling: sublane reductions, vectorized over all L lanes.
    avg = jnp.mean(x, axis=1)                       # (Nb, L)  -> conv channel 0
    mx = jnp.max(x, axis=1)                         # (Nb, L)  -> conv channel 1
    pooled = jnp.concatenate([avg, mx], axis=0)     # (2*Nb, L), sublane-packed

    # Hoisted per-tap weight columns: rows [0, Nb) use the avg-channel taps,
    # rows [Nb, 2*Nb) use the max-channel taps.  One select per tap, outside
    # the FMA loop.
    row_is_max = lax.broadcasted_iota(jnp.int32, (2 * nb, 1), 0) >= nb
    wcols = [jnp.where(row_is_max, w_ref[1, k], w_ref[0, k]) for k in range(K)]

    # K-tap, zero-padded conv as lane rolls (XLU) + masked VPU FMAs on the
    # packed (2*Nb, L) array: one roll per tap instead of one per channel.
    lane = lax.broadcasted_iota(jnp.int32, (1, L), 1)
    acc = jnp.zeros((2 * nb, L), f32)
    for k in range(K):
        d = k - pad                                 # out[l] uses in[l + d]
        if d == 0:
            acc = acc + wcols[k] * pooled
        else:
            rolled = pltpu.roll(pooled, shift=(-d) % L, axis=1)
            valid = jnp.logical_and(lane + d >= 0, lane + d < L)
            acc = acc + jnp.where(valid, wcols[k] * rolled, 0.0)

    # Combine avg-channel and max-channel contributions, then exact sigmoid.
    y = acc[:nb] + acc[nb:]                         # (Nb, L)
    sig = 1.0 / (1.0 + jnp.exp(-y))
    out_ref[...] = sig.astype(out_ref.dtype)


def _pick_block_rows(N, C, L, itemsize, budget_bytes=12 * (1 << 20)):
    """Largest Nb such that the double-buffered x block stays in budget and
    N % Nb == 0 (prefer Nb == N or a multiple of 8 for dense output stores)."""
    per_row = 2 * C * L * itemsize                  # double-buffered input bytes / row
    max_nb = max(1, budget_bytes // per_row)
    if N <= max_nb:
        return N
    best = 1
    for nb in range(1, min(N, max_nb) + 1):
        if N % nb == 0 and nb % 8 == 0:
            best = nb
    if best == 1:
        for nb in range(1, min(N, max_nb) + 1):
            if N % nb == 0:
                best = nb
    return best


def spatial_attention_forward(x, conv_w, kernel_size=7):
    """x: (N, C, L) in its native dtype; conv_w: (1, 2, K). Returns (N, 1, L) f32 gate."""
    assert kernel_size in (3, 7), "kernel size must be 3 or 7"
    N, C, L = x.shape
    K = kernel_size
    assert conv_w.shape == (1, 2, K)

    nb = _pick_block_rows(N, C, L, x.dtype.itemsize)
    assert N % nb == 0
    grid = (N // nb,)

    w2 = conv_w.reshape(2, K).astype(jnp.float32)   # scalar taps live in SMEM

    # Explicit VMEM budget (portable across v5e/v6e 128 MiB and v7x 64 MiB).
    needed = 2 * (nb * C * L * x.dtype.itemsize + nb * L * 4) + (2 << 20)
    vmem_limit = int(min(64 * (1 << 20), max(needed, 32 * (1 << 20))))

    kernel = functools.partial(
        spatial_attention_kernel, kernel_size=K, block_rows=nb)

    out2d = pl.pallas_call(
        kernel,
        grid=grid,
        out_shape=jax.ShapeDtypeStruct((N, L), jnp.float32),
        in_specs=[
            pl.BlockSpec((nb, C, L), lambda n: (n, 0, 0)),           # x block (native dtype)
            pl.BlockSpec(memory_space=pltpu.MemorySpace.SMEM),       # conv taps
        ],
        out_specs=pl.BlockSpec((nb, L), lambda n: (n, 0)),           # sublane/lane-dense
        compiler_params=pltpu.CompilerParams(
            dimension_semantics=("parallel",),                       # v7x: 2 TCs
            vmem_limit_bytes=vmem_limit),
    )(x, w2)

    return out2d.reshape(N, 1, L)


def reference_forward(x, conv_w):
    """Pure-JAX reference mirroring the PyTorch SpatialAttention module."""
    xf = x.astype(jnp.float32)
    avg = jnp.mean(xf, axis=1, keepdims=True)
    mx = jnp.max(xf, axis=1, keepdims=True)
    cat = jnp.concatenate([avg, mx], axis=1)         # (N, 2, L)
    pad = conv_w.shape[-1] // 2
    y = lax.conv_general_dilated(cat, conv_w.astype(jnp.float32),
                                 window_strides=(1,), padding=[(pad, pad)],
                                 dimension_numbers=("NCH", "OIH", "NCH"))
    return jax.nn.sigmoid(y)


if __name__ == "__main__":
    N, C, L, K = 2, 8, 128, 7

    key = jax.random.PRNGKey(0)
    kx, kw = jax.random.split(key)
    x = jax.random.normal(kx, (N, C, L), jnp.float32)
    conv_w = 0.1 * jax.random.normal(kw, (1, 2, K), jnp.float32)

    out = jax.block_until_ready(spatial_attention_forward(x, conv_w, K))
    assert out.shape == (N, 1, L), out.shape

    ref = jax.block_until_ready(reference_forward(x, conv_w))
    max_err = float(jnp.max(jnp.abs(out - ref)))
    assert bool(jnp.allclose(out, ref, atol=1e-5, rtol=1e-5)), max_err

    print("KERNEL_OK")
</pallas_src>

<mosaic_0001>
module attributes {stable_mosaic.version = 11 : i64} {
  func.func @spatial_attention_kernel(%arg0: i32, %arg1: memref<2x8x128xf32, #tpu.memory_space<vmem>>, %arg2: memref<2x7xf32, #tpu.memory_space<smem>>, %arg3: memref<2x128xf32, #tpu.memory_space<vmem>>) attributes {dimension_semantics = [#tpu.dimension_semantics<parallel>], iteration_bounds = array<i64: 1>, scalar_prefetch = 0 : i64, scratch_operands = 0 : i64, tpu.core_type = #tpu.core_type<tc>, window_params = [{transform_indices = @transform_0, window_bounds = array<i64: 2, 8, 128>}, {transform_indices = @transform_1, window_bounds = array<i64: 2, 7>}, {transform_indices = @transform_2, window_bounds = array<i64: 2, 128>}]} {
    %c0 = arith.constant 0 : index
    %c0_0 = arith.constant 0 : index
    %c0_1 = arith.constant 0 : index
    %0 = vector.load %arg1[%c0, %c0_0, %c0_1] : memref<2x8x128xf32, #tpu.memory_space<vmem>>, vector<2x8x128xf32>
    %cst = arith.constant dense<0.000000e+00> : vector<2x128xf32>
    %1 = vector.multi_reduction <add>, %0, %cst [1] : vector<2x8x128xf32> to vector<2x128xf32>
    %cst_2 = arith.constant 8.000000e+00 : f32
    %2 = vector.broadcast %cst_2 : f32 to vector<2x128xf32>
    %3 = arith.divf %1, %2 : vector<2x128xf32>
    %cst_3 = arith.constant dense<0xFF800000> : vector<2x128xf32>
    %4 = vector.multi_reduction <maximumf>, %0, %cst_3 [1] : vector<2x8x128xf32> to vector<2x128xf32>
    %5 = tpu.concatenate %3, %4 in 0 : vector<2x128xf32>, vector<2x128xf32> -> vector<4x128xf32>
    %6 = tpu.iota {dimensions = array<i32: 0>} : vector<4x1xi32>
    %c2_i32 = arith.constant 2 : i32
    %7 = vector.broadcast %c2_i32 : i32 to vector<4x1xi32>
    %8 = arith.cmpi sge, %6, %7 : vector<4x1xi32>
    %c1 = arith.constant 1 : index
    %c0_4 = arith.constant 0 : index
    %9 = memref.load %arg2[%c1, %c0_4] : memref<2x7xf32, #tpu.memory_space<smem>>
    %c0_5 = arith.constant 0 : index
    %c0_6 = arith.constant 0 : index
    %10 = memref.load %arg2[%c0_5, %c0_6] : memref<2x7xf32, #tpu.memory_space<smem>>
    %11 = vector.broadcast %9 : f32 to vector<4x1xf32>
    %12 = vector.broadcast %10 : f32 to vector<4x1xf32>
    %13 = arith.select %8, %11, %12 : vector<4x1xi1>, vector<4x1xf32>
    %c1_7 = arith.constant 1 : index
    %c1_8 = arith.constant 1 : index
    %14 = memref.load %arg2[%c1_7, %c1_8] : memref<2x7xf32, #tpu.memory_space<smem>>
    %c0_9 = arith.constant 0 : index
    %c1_10 = arith.constant 1 : index
    %15 = memref.load %arg2[%c0_9, %c1_10] : memref<2x7xf32, #tpu.memory_space<smem>>
    %16 = vector.broadcast %14 : f32 to vector<4x1xf32>
    %17 = vector.broadcast %15 : f32 to vector<4x1xf32>
    %18 = arith.select %8, %16, %17 : vector<4x1xi1>, vector<4x1xf32>
    %c1_11 = arith.constant 1 : index
    %c2 = arith.constant 2 : index
    %19 = memref.load %arg2[%c1_11, %c2] : memref<2x7xf32, #tpu.memory_space<smem>>
    %c0_12 = arith.constant 0 : index
    %c2_13 = arith.constant 2 : index
    %20 = memref.load %arg2[%c0_12, %c2_13] : memref<2x7xf32, #tpu.memory_space<smem>>
    %21 = vector.broadcast %19 : f32 to vector<4x1xf32>
    %22 = vector.broadcast %20 : f32 to vector<4x1xf32>
    %23 = arith.select %8, %21, %22 : vector<4x1xi1>, vector<4x1xf32>
    %c1_14 = arith.constant 1 : index
    %c3 = arith.constant 3 : index
    %24 = memref.load %arg2[%c1_14, %c3] : memref<2x7xf32, #tpu.memory_space<smem>>
    %c0_15 = arith.constant 0 : index
    %c3_16 = arith.constant 3 : index
    %25 = memref.load %arg2[%c0_15, %c3_16] : memref<2x7xf32, #tpu.memory_space<smem>>
    %26 = vector.broadcast %24 : f32 to vector<4x1xf32>
    %27 = vector.broadcast %25 : f32 to vector<4x1xf32>
    %28 = arith.select %8, %26, %27 : vector<4x1xi1>, vector<4x1xf32>
    %c1_17 = arith.constant 1 : index
    %c4 = arith.constant 4 : index
    %29 = memref.load %arg2[%c1_17, %c4] : memref<2x7xf32, #tpu.memory_space<smem>>
    %c0_18 = arith.constant 0 : index
    %c4_19 = arith.constant 4 : index
    %30 = memref.load %arg2[%c0_18, %c4_19] : memref<2x7xf32, #tpu.memory_space<smem>>
    %31 = vector.broadcast %29 : f32 to vector<4x1xf32>
    %32 = vector.broadcast %30 : f32 to vector<4x1xf32>
    %33 = arith.select %8, %31, %32 : vector<4x1xi1>, vector<4x1xf32>
    %c1_20 = arith.constant 1 : index
    %c5 = arith.constant 5 : index
    %34 = memref.load %arg2[%c1_20, %c5] : memref<2x7xf32, #tpu.memory_space<smem>>
    %c0_21 = arith.constant 0 : index
    %c5_22 = arith.constant 5 : index
    %35 = memref.load %arg2[%c0_21, %c5_22] : memref<2x7xf32, #tpu.memory_space<smem>>
    %36 = vector.broadcast %34 : f32 to vector<4x1xf32>
    %37 = vector.broadcast %35 : f32 to vector<4x1xf32>
    %38 = arith.select %8, %36, %37 : vector<4x1xi1>, vector<4x1xf32>
    %c1_23 = arith.constant 1 : index
    %c6 = arith.constant 6 : index
    %39 = memref.load %arg2[%c1_23, %c6] : memref<2x7xf32, #tpu.memory_space<smem>>
    %c0_24 = arith.constant 0 : index
    %c6_25 = arith.constant 6 : index
    %40 = memref.load %arg2[%c0_24, %c6_25] : memref<2x7xf32, #tpu.memory_space<smem>>
    %41 = vector.broadcast %39 : f32 to vector<4x1xf32>
    %42 = vector.broadcast %40 : f32 to vector<4x1xf32>
    %43 = arith.select %8, %41, %42 : vector<4x1xi1>, vector<4x1xf32>
    %44 = tpu.iota {dimensions = array<i32: 1>} : vector<1x128xi32>
    %cst_26 = arith.constant 0.000000e+00 : f32
    %45 = vector.broadcast %cst_26 : f32 to vector<4x128xf32>
    %c3_i32 = arith.constant 3 : i32
    %46 = tpu.dynamic_rotate %5 by %c3_i32 dim 1 : vector<4x128xf32>, i32 -> vector<4x128xf32>
    %c-3_i32 = arith.constant -3 : i32
    %47 = vector.broadcast %c-3_i32 : i32 to vector<1x128xi32>
    %48 = arith.addi %44, %47 : vector<1x128xi32>
    %c0_i32 = arith.constant 0 : i32
    %49 = vector.broadcast %c0_i32 : i32 to vector<1x128xi32>
    %50 = arith.cmpi sge, %48, %49 : vector<1x128xi32>
    %c-3_i32_27 = arith.constant -3 : i32
    %51 = vector.broadcast %c-3_i32_27 : i32 to vector<1x128xi32>
    %52 = arith.addi %44, %51 : vector<1x128xi32>
    %c128_i32 = arith.constant 128 : i32
    %53 = vector.broadcast %c128_i32 : i32 to vector<1x128xi32>
    %54 = arith.cmpi slt, %52, %53 : vector<1x128xi32>
    %55 = arith.andi %50, %54 : vector<1x128xi1>
    %56 = vector.broadcast %13 : vector<4x1xf32> to vector<4x128xf32>
    %57 = arith.mulf %56, %46 : vector<4x128xf32>
    %cst_28 = arith.constant 0.000000e+00 : f32
    %58 = vector.shape_cast %55 : vector<1x128xi1> to vector<1x128xi1>
    %59 = vector.broadcast %58 : vector<1x128xi1> to vector<4x128xi1>
    %60 = vector.broadcast %cst_28 : f32 to vector<4x128xf32>
    %61 = arith.select %59, %57, %60 : vector<4x128xi1>, vector<4x128xf32>
    %62 = arith.addf %45, %61 : vector<4x128xf32>
    %c2_i32_29 = arith.constant 2 : i32
    %63 = tpu.dynamic_rotate %5 by %c2_i32_29 dim 1 : vector<4x128xf32>, i32 -> vector<4x128xf32>
    %c-2_i32 = arith.constant -2 : i32
    %64 = vector.broadcast %c-2_i32 : i32 to vector<1x128xi32>
    %65 = arith.addi %44, %64 : vector<1x128xi32>
    %c0_i32_30 = arith.constant 0 : i32
    %66 = vector.broadcast %c0_i32_30 : i32 to vector<1x128xi32>
    %67 = arith.cmpi sge, %65, %66 : vector<1x128xi32>
    %c-2_i32_31 = arith.constant -2 : i32
    %68 = vector.broadcast %c-2_i32_31 : i32 to vector<1x128xi32>
    %69 = arith.addi %44, %68 : vector<1x128xi32>
    %c128_i32_32 = arith.constant 128 : i32
    %70 = vector.broadcast %c128_i32_32 : i32 to vector<1x128xi32>
    %71 = arith.cmpi slt, %69, %70 : vector<1x128xi32>
    %72 = arith.andi %67, %71 : vector<1x128xi1>
    %73 = vector.broadcast %18 : vector<4x1xf32> to vector<4x128xf32>
    %74 = arith.mulf %73, %63 : vector<4x128xf32>
    %cst_33 = arith.constant 0.000000e+00 : f32
    %75 = vector.shape_cast %72 : vector<1x128xi1> to vector<1x128xi1>
    %76 = vector.broadcast %75 : vector<1x128xi1> to vector<4x128xi1>
    %77 = vector.broadcast %cst_33 : f32 to vector<4x128xf32>
    %78 = arith.select %76, %74, %77 : vector<4x128xi1>, vector<4x128xf32>
    %79 = arith.addf %62, %78 : vector<4x128xf32>
    %c1_i32 = arith.constant 1 : i32
    %80 = tpu.dynamic_rotate %5 by %c1_i32 dim 1 : vector<4x128xf32>, i32 -> vector<4x128xf32>
    %c-1_i32 = arith.constant -1 : i32
    %81 = vector.broadcast %c-1_i32 : i32 to vector<1x128xi32>
    %82 = arith.addi %44, %81 : vector<1x128xi32>
    %c0_i32_34 = arith.constant 0 : i32
    %83 = vector.broadcast %c0_i32_34 : i32 to vector<1x128xi32>
    %84 = arith.cmpi sge, %82, %83 : vector<1x128xi32>
    %c-1_i32_35 = arith.constant -1 : i32
    %85 = vector.broadcast %c-1_i32_35 : i32 to vector<1x128xi32>
    %86 = arith.addi %44, %85 : vector<1x128xi32>
    %c128_i32_36 = arith.constant 128 : i32
    %87 = vector.broadcast %c128_i32_36 : i32 to vector<1x128xi32>
    %88 = arith.cmpi slt, %86, %87 : vector<1x128xi32>
    %89 = arith.andi %84, %88 : vector<1x128xi1>
    %90 = vector.broadcast %23 : vector<4x1xf32> to vector<4x128xf32>
    %91 = arith.mulf %90, %80 : vector<4x128xf32>
    %cst_37 = arith.constant 0.000000e+00 : f32
    %92 = vector.shape_cast %89 : vector<1x128xi1> to vector<1x128xi1>
    %93 = vector.broadcast %92 : vector<1x128xi1> to vector<4x128xi1>
    %94 = vector.broadcast %cst_37 : f32 to vector<4x128xf32>
    %95 = arith.select %93, %91, %94 : vector<4x128xi1>, vector<4x128xf32>
    %96 = arith.addf %79, %95 : vector<4x128xf32>
    %97 = vector.broadcast %28 : vector<4x1xf32> to vector<4x128xf32>
    %98 = arith.mulf %97, %5 : vector<4x128xf32>
    %99 = arith.addf %96, %98 : vector<4x128xf32>
    %c127_i32 = arith.constant 127 : i32
    %100 = tpu.dynamic_rotate %5 by %c127_i32 dim 1 : vector<4x128xf32>, i32 -> vector<4x128xf32>
    %c1_i32_38 = arith.constant 1 : i32
    %101 = vector.broadcast %c1_i32_38 : i32 to vector<1x128xi32>
    %102 = arith.addi %44, %101 : vector<1x128xi32>
    %c0_i32_39 = arith.constant 0 : i32
    %103 = vector.broadcast %c0_i32_39 : i32 to vector<1x128xi32>
    %104 = arith.cmpi sge, %102, %103 : vector<1x128xi32>
    %c1_i32_40 = arith.constant 1 : i32
    %105 = vector.broadcast %c1_i32_40 : i32 to vector<1x128xi32>
    %106 = arith.addi %44, %105 : vector<1x128xi32>
    %c128_i32_41 = arith.constant 128 : i32
    %107 = vector.broadcast %c128_i32_41 : i32 to vector<1x128xi32>
    %108 = arith.cmpi slt, %106, %107 : vector<1x128xi32>
    %109 = arith.andi %104, %108 : vector<1x128xi1>
    %110 = vector.broadcast %33 : vector<4x1xf32> to vector<4x128xf32>
    %111 = arith.mulf %110, %100 : vector<4x128xf32>
    %cst_42 = arith.constant 0.000000e+00 : f32
    %112 = vector.shape_cast %109 : vector<1x128xi1> to vector<1x128xi1>
    %113 = vector.broadcast %112 : vector<1x128xi1> to vector<4x128xi1>
    %114 = vector.broadcast %cst_42 : f32 to vector<4x128xf32>
    %115 = arith.select %113, %111, %114 : vector<4x128xi1>, vector<4x128xf32>
    %116 = arith.addf %99, %115 : vector<4x128xf32>
    %c126_i32 = arith.constant 126 : i32
    %117 = tpu.dynamic_rotate %5 by %c126_i32 dim 1 : vector<4x128xf32>, i32 -> vector<4x128xf32>
    %c2_i32_43 = arith.constant 2 : i32
    %118 = vector.broadcast %c2_i32_43 : i32 to vector<1x128xi32>
    %119 = arith.addi %44, %118 : vector<1x128xi32>
    %c0_i32_44 = arith.constant 0 : i32
    %120 = vector.broadcast %c0_i32_44 : i32 to vector<1x128xi32>
    %121 = arith.cmpi sge, %119, %120 : vector<1x128xi32>
    %c2_i32_45 = arith.constant 2 : i32
    %122 = vector.broadcast %c2_i32_45 : i32 to vector<1x128xi32>
    %123 = arith.addi %44, %122 : vector<1x128xi32>
    %c128_i32_46 = arith.constant 128 : i32
    %124 = vector.broadcast %c128_i32_46 : i32 to vector<1x128xi32>
    %125 = arith.cmpi slt, %123, %124 : vector<1x128xi32>
    %126 = arith.andi %121, %125 : vector<1x128xi1>
    %127 = vector.broadcast %38 : vector<4x1xf32> to vector<4x128xf32>
    %128 = arith.mulf %127, %117 : vector<4x128xf32>
    %cst_47 = arith.constant 0.000000e+00 : f32
    %129 = vector.shape_cast %126 : vector<1x128xi1> to vector<1x128xi1>
    %130 = vector.broadcast %129 : vector<1x128xi1> to vector<4x128xi1>
    %131 = vector.broadcast %cst_47 : f32 to vector<4x128xf32>
    %132 = arith.select %130, %128, %131 : vector<4x128xi1>, vector<4x128xf32>
    %133 = arith.addf %116, %132 : vector<4x128xf32>
    %c125_i32 = arith.constant 125 : i32
    %134 = tpu.dynamic_rotate %5 by %c125_i32 dim 1 : vector<4x128xf32>, i32 -> vector<4x128xf32>
    %c3_i32_48 = arith.constant 3 : i32
    %135 = vector.broadcast %c3_i32_48 : i32 to vector<1x128xi32>
    %136 = arith.addi %44, %135 : vector<1x128xi32>
    %c0_i32_49 = arith.constant 0 : i32
    %137 = vector.broadcast %c0_i32_49 : i32 to vector<1x128xi32>
    %138 = arith.cmpi sge, %136, %137 : vector<1x128xi32>
    %c3_i32_50 = arith.constant 3 : i32
    %139 = vector.broadcast %c3_i32_50 : i32 to vector<1x128xi32>
    %140 = arith.addi %44, %139 : vector<1x128xi32>
    %c128_i32_51 = arith.constant 128 : i32
    %141 = vector.broadcast %c128_i32_51 : i32 to vector<1x128xi32>
    %142 = arith.cmpi slt, %140, %141 : vector<1x128xi32>
    %143 = arith.andi %138, %142 : vector<1x128xi1>
    %144 = vector.broadcast %43 : vector<4x1xf32> to vector<4x128xf32>
    %145 = arith.mulf %144, %134 : vector<4x128xf32>
    %cst_52 = arith.constant 0.000000e+00 : f32
    %146 = vector.shape_cast %143 : vector<1x128xi1> to vector<1x128xi1>
    %147 = vector.broadcast %146 : vector<1x128xi1> to vector<4x128xi1>
    %148 = vector.broadcast %cst_52 : f32 to vector<4x128xf32>
    %149 = arith.select %147, %145, %148 : vector<4x128xi1>, vector<4x128xf32>
    %150 = arith.addf %133, %149 : vector<4x128xf32>
    %151 = vector.extract_strided_slice %150 {offsets = [0, 0], sizes = [2, 128], strides = [1, 1]} : vector<4x128xf32> to vector<2x128xf32>
    %152 = vector.extract_strided_slice %150 {offsets = [2, 0], sizes = [2, 128], strides = [1, 1]} : vector<4x128xf32> to vector<2x128xf32>
    %153 = arith.addf %151, %152 : vector<2x128xf32>
    %cst_53 = arith.constant 0.000000e+00 : f32
    %154 = vector.broadcast %cst_53 : f32 to vector<2x128xf32>
    %155 = arith.subf %154, %153 : vector<2x128xf32>
    %156 = math.exp %155 : vector<2x128xf32>
    %cst_54 = arith.constant 1.000000e+00 : f32
    %157 = vector.broadcast %cst_54 : f32 to vector<2x128xf32>
    %158 = arith.addf %157, %156 : vector<2x128xf32>
    %cst_55 = arith.constant 1.000000e+00 : f32
    %159 = vector.broadcast %cst_55 : f32 to vector<2x128xf32>
    %160 = arith.divf %159, %158 : vector<2x128xf32>
    %c0_56 = arith.constant 0 : index
    %c0_57 = arith.constant 0 : index
    %161 = vector.load %arg3[%c0_56, %c0_57] : memref<2x128xf32, #tpu.memory_space<vmem>>, vector<2x128xf32>
    tpu.vector_store %arg3[%c0_56, %c0_57], %160 {strides = array<i32>} : memref<2x128xf32, #tpu.memory_space<vmem>>, vector<2x128xf32>,
    return
  }
  func.func @transform_0(%arg0: i32) -> (i32, i32, i32) {
    %c0_i32 = arith.constant 0 : i32
    %c0_i32_0 = arith.constant 0 : i32
    %c0_i32_1 = arith.constant 0 : i32
    return %arg0, %c0_i32, %c0_i32_0 : i32, i32, i32
  }
  func.func @transform_1(%arg0: i32) -> (i32, i32) {
    %c0_i32 = arith.constant 0 : i32
    %c0_i32_0 = arith.constant 0 : i32
    %c0_i32_1 = arith.constant 0 : i32
    return %c0_i32, %c0_i32_0 : i32, i32
  }
  func.func @transform_2(%arg0: i32) -> (i32, i32) {
    %c0_i32 = arith.constant 0 : i32
    %c0_i32_0 = arith.constant 0 : i32
    return %arg0, %c0_i32 : i32, i32
  }
}

</mosaic_0001>

<bundles_post_ra>
// kernel: tpu_custom_call.1
= control target key start
LH: loop header
LB: loop body
LE: loop exit
PB: predicated region body
PF: predicated region fallthrough
CT: control target
= control target key end

     0   :  { %7 = vsyncpa [#allocation3], 0  ;;  %s396_s0 = inlined_call_operand.hbm [shape: f32[2,8,128], index: 0, kind: input, shape index: {}]   ;;  %s397_s1 = inlined_call_operand.vmem [shape: f32[2,7], index: 1, kind: input, shape index: {}]   ;;  %s398_s2 = inlined_call_operand.hbm [shape: f32[2,128], index: 2, kind: output, shape index: {}]  }
   0x1   :  { %8 = vsyncpa [#allocation5], 0 }
   0x2   :  { %9 = vsyncpa [#allocation4], 0  ;;  %s305_s9 = smov [#allocation2]   ;;  %s28_s13 = sshll.u32 %s397_s1, 4  ;;  %s29_s13 = int_to_ptr.vmem [resolvable:$true] %s28_s13 }
   0x3   :  { %s15_s10 = sshll.u32 %s305_s9, 4  ;;  %s243_s16 = scalar_lea.hbm %s396_s0, 256  ;;  %s16_s10 = int_to_ptr.vmem [resolvable:$true] %s15_s10 }
   0x4   :  { %p244_p0 = scmp.ne.s32.totalorder %s396_s0, %s243_s16  ;;  %p247_p1 = scmp.lt.u32.totalorder %s243_s16, %s396_s0 }
   0x6   :  { %p249_p2 = pnand %p247_p1, %p244_p0 }
   0x8   :  { %252 = shalt.err (!%p249_p2)
}
   0x9   :  { %s253_s21 = scalar_lea.vmem %s16_s10, 256  ;;  %p258_p4 = scmp.lt.s32.totalorder %s16_s10, %s16_s10 }
   0xa   :  { %p254_p3 = scmp.ne.s32.totalorder %s16_s10, %s253_s21  ;;  %p259_p5 = scmp.lt.s32.totalorder %s253_s21, %s253_s21 }
   0xc   :  { %p260_p6 = por %p259_p5, %p258_p4 }
   0xe   :  { %p261_p7 = pnand %p260_p6, %p254_p3 }
  0x10   :  { %264 = shalt.err (!%p261_p7)
}
  0x11   :  { %s306_s1 = smov 128   ;;  %s307_s22 = smov 8  }
  0x12   :  { %21 = dma.hbm_to_vmem [thread:$0]  %s396_s0, 256, %s16_s10, [#allocation3], %s306_s1, %s306_s1, %s307_s22  }
  0x13   :  { %s265_s25 = scalar_lea.vmem %s29_s13, 32  ;;  %p270_p9 = scmp.lt.s32.totalorder %s29_s13, %s29_s13 }
  0x14   :  { %p266_p8 = scmp.ne.s32.totalorder %s29_s13, %s265_s25  ;;  %p271_p10 = scmp.lt.s32.totalorder %s265_s25, %s265_s25 }
  0x16   :  { %p272_p11 = por %p271_p10, %p270_p9 }
  0x18   :  { %p273_p12 = pnand %p272_p11, %p266_p8 }
  0x1a   :  { %276 = shalt.err (!%p273_p12)
}
  0x1b   :  { %s308_s26 = smov [#allocation6]  }
  0x1c   :  { %31 = dma.vmem_to_smem %s29_s13, 32, %s308_s26, [#allocation5]  }
  0x1d   :  { %299 = dma.done.wait [#allocation3], 256  }
  0x1e   :  { %300 = vsyncadd [#allocation3], 4294967040 }
  0x1f   :  { %301 = dma.done.wait [#allocation5], 32  }
  0x20   :  { %302 = vsyncadd [#allocation5], 4294967264 }
  0x21   :  { %38 = sfence }
  0x22   :  { %v39_v0 = vld [vmem:[#allocation2] sm:$0xff]  ;;  %v40_v1 = vld [vmem:[#allocation2 + $0x8] sm:$0xff]  ;;  %vm75_vm0 = vcmask 1043459   ;;  %vm70_vm1 = vcmask 1041409   ;;  %vm78_vm2 = vcmask 1041408   ;;  %s309_s0 = smov 3   ;;  %v80_v29 = vlaneseq }
  0x23   :  { %v41_v2 = vrot.slane %v39_v0, 4  ;;  %v47_v3 = vrot.slane %v40_v1, 4  ;;  %s310_s27 = smov 1   ;;  %s311_s28 = smov 2  }
  0x24   :  { %s312_s29 = smov 127   ;;  %s313_s30 = smov 126   ;;  %v81_v30 = vshrl.u32 %v80_v29, 7  ;;  %v119_v31 = vand.u32 127, %v80_v29 }
  0x25   :  { %v42_v4 = vadd.f32 %v41_v2, %v39_v0  ;;  %v48_v5 = vadd.f32 %v47_v3, %v40_v1  ;;  %v57_v6 = vmax.f32 %v39_v0, %v41_v2  ;;  %v63_v7 = vmax.f32 %v40_v1, %v47_v3  ;;  %s314_s3 = smov 125   ;;  %s215_s4 = sld [smem:[#allocation6 + $0x80]] }
  0x26   :  { %s84_s5 = sld [smem:[#allocation6]]  ;;  %s218_s6 = sld [smem:[#allocation6 + $0x82]]  ;;  %vm82_vm3 = vcmp.ge.s32.totalorder %v81_v30, 2  ;;  %v122_v36 = vadd.s32 4294967293, %v119_v31  ;;  %v133_v43 = vadd.s32 4294967294, %v119_v31  ;;  %v144_v45 = vadd.s32 4294967295, %v119_v31 }
  0x27   :  { %v43_v8 = vrot.slane %v42_v4, 2  ;;  %v49_v9 = vrot.slane %v48_v5, 2  ;;  %v58_v10 = vrot.slane %v57_v6, 2  ;;  %v64_v11 = vrot.slane %v63_v7, 2  ;;  %s219_s7 = sld [smem:[#allocation6 + $0x2]]  ;;  %s354_s8 = sld [smem:[#allocation6 + $0x81]] }
  0x28   :  { %s217_s9 = sld [smem:[#allocation6 + $0x1]]  ;;  %s220_s10 = sld [smem:[#allocation6 + $0x83]]  ;;  %vm123_vm4 = vcmp.ge.s32.totalorder %v122_v36, 0  ;;  %vm134_vm5 = vcmp.ge.s32.totalorder %v133_v43, 0  ;;  %vm145_vm6 = vcmp.ge.s32.totalorder %v144_v45, 0  ;;  %v157_v57 = vadd.s32 1, %v119_v31 }
  0x29   :  { %v44_v12 = vadd.f32 %v43_v8, %v42_v4  ;;  %v50_v13 = vadd.f32 %v49_v9, %v48_v5  ;;  %v59_v14 = vmax.f32 %v57_v6, %v58_v10  ;;  %v65_v15 = vmax.f32 %v63_v7, %v64_v11  ;;  %s221_s11 = sld [smem:[#allocation6 + $0x3]]  ;;  %s356_s12 = sld [smem:[#allocation6 + $0x84]] }
  0x2a   :  { %s358_s13 = sld [smem:[#allocation6 + $0x4]]  ;;  %s360_s14 = sld [smem:[#allocation6 + $0x85]]  ;;  %v168_v0 = vadd.s32 2, %v119_v31  ;;  %vm159_vm7 = vcmp.lt.s32.totalorder %v157_v57, 128  ;;  %v179_v8 = vadd.s32 3, %v119_v31 }
  0x2b   :  { %v45_v16 = vrot.slane %v44_v12, 1  ;;  %v51_v17 = vrot.slane %v50_v13, 1  ;;  %v60_v18 = vrot.slane %v59_v14, 1  ;;  %v66_v19 = vrot.slane %v65_v15, 1  ;;  %s362_s15 = sld [smem:[#allocation6 + $0x5]]  ;;  %s364_s16 = sld [smem:[#allocation6 + $0x86]] }
  0x2c   :  { %v85_v32 = vstv %s215_s4  ;;  %v86_v33 = vstv %s84_s5  ;;  %v95_v34 = vstv %s218_s6  ;;  %s366_s17 = sld [smem:[#allocation6 + $0x6]]  ;;  %vm170_vm8 = vcmp.lt.s32.totalorder %v168_v0, 128  ;;  %s315_s18 = smov [#allocation7]  }
  0x2d   :  { %v46_v20 = vadd.f32 %v45_v16, %v44_v12  ;;  %v52_v21 = vadd.f32 %v51_v17, %v50_v13  ;;  %v61_v22 = vmax.f32 %v59_v14, %v60_v18  ;;  %v67_v23 = vmax.f32 %v65_v15, %v66_v19  ;;  %s205_s19 = sshll.u32 %s315_s18, 4  ;;  %s206_s19 = int_to_ptr.vmem [resolvable:$true] %s205_s19 }
  0x2e   :  { %v96_v35 = vstv %s219_s7  ;;  %v90_v37 = vstv %s354_s8  ;;  %v91_v38 = vstv %s217_s9  ;;  %v100_v39 = vstv %s220_s10  ;;  %s277_s20 = scalar_lea.vmem %s206_s19, 32  ;;  %p282_p0 = scmp.lt.s32.totalorder %s206_s19, %s206_s19 }
  0x2f   :  { %v54_v24 = vmul.f32 0.125, %v46_v20  ;;  %v55_v25 = vmul.f32 0.125, %v52_v21  ;;  %v76_v26 = vsel %vm75_vm0, %v67_v23, %v61_v22  ;;  %v101_v40 = vstv %s221_s11  ;;  %p278_p13 = scmp.ne.s32.totalorder %s206_s19, %s277_s20  ;;  %p283_p1 = scmp.lt.s32.totalorder %s277_s20, %s277_s20 }
  0x30   :  { %v87_v41 = vsel %vm82_vm3, %v85_v32, %v86_v33  ;;  %v97_v44 = vsel %vm82_vm3, %v95_v34, %v96_v35  ;;  %v105_v47 = vstv %s356_s12  ;;  %v106_v48 = vstv %s358_s13 }
  0x31   :  { %v71_v27 = vsel %vm70_vm1, %v55_v25, %v54_v24  ;;  %v92_v49 = vsel %vm82_vm3, %v90_v37, %v91_v38  ;;  %v102_v50 = vsel %vm82_vm3, %v100_v39, %v101_v40  ;;  %v110_v53 = vstv %s360_s14  ;;  %p284_p2 = por %p283_p1, %p282_p0 }
  0x32   :  { %v346_v28 = vsel %vm78_vm2, %v71_v27, %v76_v26  ;;  %v111_v54 = vstv %s362_s15  ;;  %v107_v56 = vsel %vm82_vm3, %v105_v47, %v106_v48  ;;  %v115_v60 = vstv %s364_s16 }
  0x33   :  { %120 = vrot.lane.b32.xlu0 %v346_v28, %s309_s0  ;;  %142 = vrot.lane.b32.xlu1 %v346_v28, %s310_s27  ;;  %v116_v61 = vstv %s366_s17  ;;  %v153_v62 = vmul.f32 %v102_v50, %v346_v28  ;;  %v112_v63 = vsel %vm82_vm3, %v110_v53, %v111_v54  ;;  %vm181_vm9 = vcmp.lt.s32.totalorder %v179_v8, 128  ;;  %p285_p3 = pnand %p284_p2, %p278_p13 }
  0x34   :  { %v117_v7 = vsel %vm82_vm3, %v115_v60, %v116_v61 }
  0x37   :  { %131 = vrot.lane.b32.xlu0 %v346_v28, %s311_s28  ;;  %155 = vrot.lane.b32.xlu1 %v346_v28, %s312_s29 }
  0x3b   :  { %166 = vrot.lane.b32.xlu0 %v346_v28, %s313_s30  ;;  %177 = vrot.lane.b32.xlu1 %v346_v28, %s314_s3 }
  0xa5   :  { %v121_v42 = vpop.permute.xlu0 %120  ;;  %v143_v46 = vpop.permute.xlu1 %142 }
  0xa6   :  { %v126_v51 = vmul.f32 %v121_v42, %v87_v41  ;;  %v148_v52 = vmul.f32 %v143_v46, %v97_v44 }
  0xa8   :  { %v129_v1 = vsel %vm123_vm4, %v126_v51, 0.0  ;;  %v151_v3 = vsel %vm145_vm6, %v148_v52, 0.0 }
  0xa9   :  { %v132_v55 = vpop.permute.xlu0 %131  ;;  %v156_v58 = vpop.permute.xlu1 %155 }
  0xaa   :  { %v137_v59 = vmul.f32 %v132_v55, %v92_v49  ;;  %v161_v4 = vmul.f32 %v156_v58, %v107_v56 }
  0xac   :  { %v140_v2 = vsel %vm134_vm5, %v137_v59, 0.0  ;;  %v164_v12 = vsel %vm159_vm7, %v161_v4, 0.0 }
  0xad   :  { %v141_v5 = vadd.f32 %v140_v2, %v129_v1  ;;  %v167_v6 = vpop.permute.xlu0 %166  ;;  %v178_v9 = vpop.permute.xlu1 %177 }
  0xae   :  { %v172_v10 = vmul.f32 %v167_v6, %v112_v63  ;;  %v183_v13 = vmul.f32 %v178_v9, %v117_v7 }
  0xaf   :  { %v152_v11 = vadd.f32 %v151_v3, %v141_v5 }
  0xb0   :  { %v175_v15 = vsel %vm170_vm8, %v172_v10, 0.0  ;;  %v186_v17 = vsel %vm181_vm9, %v183_v13, 0.0 }
  0xb1   :  { %v154_v14 = vadd.f32 %v153_v62, %v152_v11 }
  0xb3   :  { %v165_v16 = vadd.f32 %v164_v12, %v154_v14 }
  0xb5   :  { %v176_v18 = vadd.f32 %v175_v15, %v165_v16 }
  0xb7   :  { %v187_v19 = vadd.f32 %v186_v17, %v176_v18 }
  0xb9   :  { %v189_v20 = vrot.slane %v187_v19, 2 }
  0xbb   :  { %v191_v21 = vadd.f32 %v189_v20, %v187_v19 }
  0xbd   :  { %v192_v22 = vsub.f32 0.0, %v191_v21 }
  0xbf   :  { %v193_v23 = vmul.f32 1.442695, %v192_v22 }
  0xc1   :  { %239 = vpow2.f32 %v193_v23 }
  0xcb   :  { %v240_v24 = vpop.eup %239 }
  0xcc   :  { %v195_v25 = vadd.f32 1.0, %v240_v24 }
  0xce   :  { %241 = vrcp.f32 %v195_v25 }
  0xd8   :  { %v242_v26 = vpop.eup %241 }
  0xd9   :  { %198 = vst [vmem:[#allocation7] sm:$0x3] %v242_v26 }
  0xda   :  { %288 = shalt.err (!%p285_p3)
}
  0xdb   :  { %s289_s22 = scalar_lea.hbm %s398_s2, 32 }
  0xdc   :  { %p290_p4 = scmp.ne.s32.totalorder %s398_s2, %s289_s22  ;;  %p293_p5 = scmp.lt.u32.totalorder %s289_s22, %s398_s2 }
  0xde   :  { %p295_p6 = pnand %p293_p5, %p290_p4 }
  0xe0   :  { %298 = shalt.err (!%p295_p6)
}
  0xe1   :  { %208 = dma.vmem_to_hbm [thread:$0]  %s206_s19, 32, %s398_s2, [#allocation4]  }
  0xe2   :  { %303 = dma.done.wait [#allocation4], 32  }
  0xe3   :  { %304 = vsyncadd [#allocation4], 4294967264 }
  0xe4   :  { %212 = vsyncpa [#allocation3], 1 }
  0xe5   :  { %213 = vsyncpa [#allocation4], 1 }
  0xe6   :  { %214 = vsyncpa [#allocation5], 1 }

</bundles_post_ra>
